<compile_context>
chip_gen: v7x
topology: tpu7x:2x2x1
jax: 0.10.0
libtpu: 0.0.40
codegen_flags: <defaults>
</compile_context>

<pallas_src>
import functools
import math
from typing import NamedTuple, Tuple

import jax
import jax.numpy as jnp
from jax.experimental import pallas as pl
from jax.experimental.pallas import tpu as pltpu


class AEMeta(NamedTuple):
    dims: Tuple[int, ...]          # real feature widths d0..dL (layer l: dl -> d_{l+1})
    dims_pad: Tuple[int, ...]      # lane-padded (multiple of 128) widths
    relu: Tuple[bool, ...]         # ReLU flag per layer
    n_enc: int                     # number of encoder linear layers
    bias_offsets: Tuple[int, ...]  # per-layer offset into the fused bias row


def _pad128(n):
    return ((n + 127) // 128) * 128


# ----------------------------------------------------------------------------
# Fused Pallas kernel: full encoder + decoder chain for one batch tile
# ----------------------------------------------------------------------------
def _fused_ae_kernel(*refs, meta):
    n_layers = len(meta.relu)
    x_ref = refs[0]
    w_refs = refs[1:1 + n_layers]            # bf16, pre-transposed & padded
    b_ref = refs[1 + n_layers]               # (1, sum_dout_pad) f32
    enc_ref = refs[2 + n_layers]
    dec_ref = refs[3 + n_layers]

    h = x_ref[...].astype(jnp.float32)       # (tb, din_pad) f32
    for li in range(n_layers):               # static unroll -> straight-line code
        dout_pad = meta.dims_pad[li + 1]
        off = meta.bias_offsets[li]          # static, multiple of 128
        w = w_refs[li][...]                  # (din_pad, dout_pad) bf16
        b = b_ref[:, off:off + dout_pad]     # (1, dout_pad) f32, static slice
        # bf16 x bf16 on the MXU, f32 accumulation; bias/ReLU stay f32 (v5e VPU).
        h = jnp.dot(h.astype(w.dtype), w, preferred_element_type=jnp.float32) + b
        if meta.relu[li]:
            h = jnp.maximum(h, 0.0)
        if li == meta.n_enc - 1:
            enc_ref[...] = h.astype(enc_ref.dtype)
    dec_ref[...] = h.astype(dec_ref.dtype)


def _pick_batch_tile(B):
    """Rows per grid step: multiple of 8, big enough to amortize the ~0.35us
    per-step overhead, capped at 2048, and <= ceil(B/2) so the 'parallel'
    batch axis has >=2 steps when B >= 16 (v7x megacore)."""
    half = pl.cdiv(B, 2)
    tb = pl.cdiv(half, 8) * 8
    return int(max(8, min(2048, tb)))


def _vmem_limit_bytes(tb, dims_pad, n_enc, w_bytes, b_bytes, itemsize):
    tile_in = 2 * tb * dims_pad[0] * itemsize                       # double-buffered input
    tile_out = 2 * tb * (dims_pad[n_enc] + dims_pad[-1]) * itemsize  # double-buffered outputs
    act = 4 * tb * max(dims_pad) * 4                                 # f32 activation temporaries
    need = w_bytes + b_bytes + tile_in + tile_out + act + (4 << 20)
    # Floor at 16 MiB (never worse than default scoped VMEM), cap at 48 MiB
    # (safe under v7x's 64 MiB physical VMEM; v5e/v6e have 128 MiB).
    return int(min(max(need, 16 << 20), 48 << 20))


# ----------------------------------------------------------------------------
# JIT-ed forward: one pallas_call for the whole model
# ----------------------------------------------------------------------------
@functools.partial(jax.jit, static_argnames=("meta",))
def autoencoder_forward(x, weights, b_all, meta):
    """Fused AutoEncoder forward. Returns (encoded, decoded) with real
    (unpadded) shapes, matching the PyTorch module."""
    B, Din = x.shape
    n_layers = len(meta.relu)
    dims_pad = meta.dims_pad
    din_pad = dims_pad[0]
    proj_pad, out_pad = dims_pad[meta.n_enc], dims_pad[-1]
    proj_dim, out_dim = meta.dims[meta.n_enc], meta.dims[-1]

    tb = _pick_batch_tile(B)
    n_tiles = int(pl.cdiv(B, tb))
    B_pad = n_tiles * tb

    # Lane-dense padded input; extra rows/cols are zero (cols stay exactly
    # zero through the chain because padded weight rows/cols and bias pads
    # are zero; padded rows are sliced off below).
    x_pad = jnp.zeros((B_pad, din_pad), x.dtype).at[:B, :Din].set(x)

    in_specs = [pl.BlockSpec((tb, din_pad), lambda i: (i, 0))]
    for w in weights:
        # Resident params: constant index_map + single buffering (halves the
        # weight VMEM footprint vs the default double-buffering).
        in_specs.append(pl.BlockSpec(w.shape, lambda i: (0, 0),
                                     pipeline_mode=pl.Buffered(1)))
    in_specs.append(pl.BlockSpec(b_all.shape, lambda i: (0, 0),
                                 pipeline_mode=pl.Buffered(1)))

    out_specs = (
        pl.BlockSpec((tb, proj_pad), lambda i: (i, 0)),   # lane-dense (128-mult)
        pl.BlockSpec((tb, out_pad), lambda i: (i, 0)),
    )
    out_shape = (
        jax.ShapeDtypeStruct((B_pad, proj_pad), x.dtype),
        jax.ShapeDtypeStruct((B_pad, out_pad), x.dtype),
    )

    itemsize = jnp.dtype(x.dtype).itemsize
    w_bytes = sum(int(w.size) * jnp.dtype(w.dtype).itemsize for w in weights)
    b_bytes = int(b_all.size) * jnp.dtype(b_all.dtype).itemsize
    flops = 2 * B_pad * sum(dims_pad[l] * dims_pad[l + 1] for l in range(n_layers))
    bytes_accessed = (B_pad * (din_pad + proj_pad + out_pad)) * itemsize + w_bytes + b_bytes
    cost = pl.CostEstimate(flops=flops, transcendentals=0,
                           bytes_accessed=bytes_accessed)

    kernel = functools.partial(_fused_ae_kernel, meta=meta)
    encoded_p, decoded_p = pl.pallas_call(
        kernel,
        out_shape=out_shape,
        grid=(n_tiles,),
        in_specs=in_specs,
        out_specs=out_specs,
        compiler_params=pltpu.CompilerParams(
            dimension_semantics=("parallel",),           # batch tiles independent
            vmem_limit_bytes=_vmem_limit_bytes(tb, dims_pad, meta.n_enc,
                                               w_bytes, b_bytes, itemsize)),
        cost_estimate=cost,
    )(x_pad, *weights, b_all)

    return encoded_p[:B, :proj_dim], decoded_p[:B, :out_dim]


# ----------------------------------------------------------------------------
# Parameter construction mirroring AutoEncoder.__init__ (padded + bf16)
# ----------------------------------------------------------------------------
def build_autoencoder_params(key, n_deep, n_neurons_start, input_dimension,
                             projection_dimension, weight_dtype=jnp.bfloat16):
    """Returns (weights, b_all, meta).

    Weights are pre-transposed (Din, Dout), zero-padded to 128-multiples and
    stored in `weight_dtype` (bf16 by default).  All biases are zero-padded
    and concatenated into one (1, sum_dout_pad) float32 row."""
    # --- layer widths, exactly as the PyTorch module builds them ---
    dims = [input_dimension]
    relu = []
    n_dec = n_neurons_start
    for n in range(n_deep):
        if n == 0:
            dims.append(n_dec)
        else:
            n_dec = int(n_dec / 2)
            dims.append(n_dec)
        relu.append(True)
    dims.append(projection_dimension)
    relu.append(False)
    n_enc = n_deep + 1
    rev = int(n_neurons_start / 2 ** (n_deep - 1))
    dims.append(rev)
    relu.append(True)
    for n in range(n_deep):
        if n == n_deep - 1:
            dims.append(input_dimension)
            relu.append(False)
        else:
            rev = int(rev * 2)
            dims.append(rev)
            relu.append(True)

    n_layers = len(relu)
    dims_pad = tuple(_pad128(d) for d in dims)

    keys = jax.random.split(key, n_layers)
    weights, bias_chunks, bias_offsets = [], [], []
    off = 0
    for li in range(n_layers):
        fan_in, fan_out = dims[li], dims[li + 1]
        din_p, dout_p = dims_pad[li], dims_pad[li + 1]
        kw, kb = jax.random.split(keys[li])
        bound = 1.0 / math.sqrt(fan_in)             # PyTorch-like uniform init
        w = jax.random.uniform(kw, (fan_in, fan_out), jnp.float32, -bound, bound)
        b = jax.random.uniform(kb, (fan_out,), jnp.float32, -bound, bound)
        w_pad = jnp.zeros((din_p, dout_p), jnp.float32).at[:fan_in, :fan_out].set(w)
        b_pad = jnp.zeros((dout_p,), jnp.float32).at[:fan_out].set(b)
        weights.append(w_pad.astype(weight_dtype))
        bias_chunks.append(b_pad)
        bias_offsets.append(off)
        off += dout_p

    b_all = jnp.concatenate(bias_chunks).reshape(1, off)
    meta = AEMeta(dims=tuple(dims), dims_pad=dims_pad, relu=tuple(relu),
                  n_enc=n_enc, bias_offsets=tuple(bias_offsets))
    return tuple(weights), b_all, meta


# ----------------------------------------------------------------------------
# Pure-JAX reference (same padded bf16 params, same math, no Pallas)
# ----------------------------------------------------------------------------
def autoencoder_forward_ref(x, weights, b_all, meta):
    B, Din = x.shape
    h = jnp.zeros((B, meta.dims_pad[0]), jnp.float32).at[:, :Din].set(
        x.astype(jnp.float32))
    encoded = None
    for li in range(len(meta.relu)):
        w = weights[li]
        off = meta.bias_offsets[li]
        dout_p = meta.dims_pad[li + 1]
        b = b_all[:, off:off + dout_p]
        h = jnp.dot(h.astype(w.dtype), w, preferred_element_type=jnp.float32) + b
        if meta.relu[li]:
            h = jnp.maximum(h, 0.0)
        if li == meta.n_enc - 1:
            encoded = h[:, :meta.dims[meta.n_enc]]
    decoded = h[:, :meta.dims[-1]]
    return encoded, decoded


# TODO(synk): the module's MSE loss_function (reduction='sum') is not part of
# forward() and is left out of the kernel.

if __name__ == "__main__":
    # Small config: n_deep=2, n_neurons_start=32, input_dim=16, projection=4
    n_deep = 2
    n_neurons_start = 32
    input_dimension = 16
    projection_dimension = 4
    batch = 24            # exercises the cdiv grid + batch padding path (tb=16)

    key = jax.random.PRNGKey(0)
    kx, kp = jax.random.split(key)
    x = jax.random.normal(kx, (batch, input_dimension), jnp.float32)

    weights, b_all, meta = build_autoencoder_params(
        kp, n_deep, n_neurons_start, input_dimension, projection_dimension)

    encoded, decoded = autoencoder_forward(x, weights, b_all, meta)
    encoded = jax.block_until_ready(encoded)
    decoded = jax.block_until_ready(decoded)

    enc_ref, dec_ref = autoencoder_forward_ref(x, weights, b_all, meta)
    assert encoded.shape == (batch, projection_dimension)
    assert decoded.shape == (batch, input_dimension)
    assert jnp.allclose(encoded, enc_ref, atol=1e-3, rtol=1e-3)
    assert jnp.allclose(decoded, dec_ref, atol=1e-3, rtol=1e-3)

    print("KERNEL_OK")
</pallas_src>

<mosaic_0001>
module attributes {stable_mosaic.version = 11 : i64} {
  func.func @_fused_ae_kernel(%arg0: i32, %arg1: memref<16x128xf32, #tpu.memory_space<vmem>>, %arg2: memref<128x128xbf16, #tpu.memory_space<vmem>>, %arg3: memref<128x128xbf16, #tpu.memory_space<vmem>>, %arg4: memref<128x128xbf16, #tpu.memory_space<vmem>>, %arg5: memref<128x128xbf16, #tpu.memory_space<vmem>>, %arg6: memref<128x128xbf16, #tpu.memory_space<vmem>>, %arg7: memref<128x128xbf16, #tpu.memory_space<vmem>>, %arg8: memref<1x768xf32, #tpu.memory_space<vmem>>, %arg9: memref<16x128xf32, #tpu.memory_space<vmem>>, %arg10: memref<16x128xf32, #tpu.memory_space<vmem>>) attributes {dimension_semantics = [#tpu.dimension_semantics<parallel>], iteration_bounds = array<i64: 2>, scalar_prefetch = 0 : i64, scratch_operands = 0 : i64, tpu.core_type = #tpu.core_type<tc>, window_params = [{transform_indices = @transform_0, window_bounds = array<i64: 16, 128>}, {pipeline_mode = #tpu.pipeline_mode<synchronous>, transform_indices = @transform_1, window_bounds = array<i64: 128, 128>}, {pipeline_mode = #tpu.pipeline_mode<synchronous>, transform_indices = @transform_2, window_bounds = array<i64: 128, 128>}, {pipeline_mode = #tpu.pipeline_mode<synchronous>, transform_indices = @transform_3, window_bounds = array<i64: 128, 128>}, {pipeline_mode = #tpu.pipeline_mode<synchronous>, transform_indices = @transform_4, window_bounds = array<i64: 128, 128>}, {pipeline_mode = #tpu.pipeline_mode<synchronous>, transform_indices = @transform_5, window_bounds = array<i64: 128, 128>}, {pipeline_mode = #tpu.pipeline_mode<synchronous>, transform_indices = @transform_6, window_bounds = array<i64: 128, 128>}, {pipeline_mode = #tpu.pipeline_mode<synchronous>, transform_indices = @transform_7, window_bounds = array<i64: 1, 768>}, {transform_indices = @transform_8, window_bounds = array<i64: 16, 128>}, {transform_indices = @transform_9, window_bounds = array<i64: 16, 128>}]} {
    %c0 = arith.constant 0 : index
    %c0_0 = arith.constant 0 : index
    %0 = vector.load %arg1[%c0, %c0_0] : memref<16x128xf32, #tpu.memory_space<vmem>>, vector<16x128xf32>
    %c0_1 = arith.constant 0 : index
    %c0_2 = arith.constant 0 : index
    %1 = vector.load %arg2[%c0_1, %c0_2] : memref<128x128xbf16, #tpu.memory_space<vmem>>, vector<128x128xbf16>
    %c0_3 = arith.constant 0 : index
    %c0_4 = arith.constant 0 : index
    %2 = vector.load %arg8[%c0_3, %c0_4] : memref<1x768xf32, #tpu.memory_space<vmem>>, vector<1x128xf32>
    %3 = arith.truncf %0 : vector<16x128xf32> to vector<16x128xbf16>
    %cst = arith.constant dense<0.000000e+00> : vector<16x128xf32>
    %4 = tpu.matmul %3, %1, %cst {dimension_numbers = #tpu.dot_dimension_numbers<[1], [0], [0], [1], [0, 0, 1, 1], [], []>} : vector<16x128xbf16>, vector<128x128xbf16>, vector<16x128xf32> -> vector<16x128xf32>
    %5 = vector.broadcast %2 : vector<1x128xf32> to vector<16x128xf32>
    %6 = arith.addf %4, %5 : vector<16x128xf32>
    %cst_5 = arith.constant 0.000000e+00 : f32
    %7 = vector.broadcast %cst_5 : f32 to vector<16x128xf32>
    %8 = arith.maximumf %6, %7 : vector<16x128xf32>
    %c0_6 = arith.constant 0 : index
    %c0_7 = arith.constant 0 : index
    %9 = vector.load %arg3[%c0_6, %c0_7] : memref<128x128xbf16, #tpu.memory_space<vmem>>, vector<128x128xbf16>
    %c0_8 = arith.constant 0 : index
    %c128 = arith.constant 128 : index
    %10 = vector.load %arg8[%c0_8, %c128] : memref<1x768xf32, #tpu.memory_space<vmem>>, vector<1x128xf32>
    %11 = arith.truncf %8 : vector<16x128xf32> to vector<16x128xbf16>
    %cst_9 = arith.constant dense<0.000000e+00> : vector<16x128xf32>
    %12 = tpu.matmul %11, %9, %cst_9 {dimension_numbers = #tpu.dot_dimension_numbers<[1], [0], [0], [1], [0, 0, 1, 1], [], []>} : vector<16x128xbf16>, vector<128x128xbf16>, vector<16x128xf32> -> vector<16x128xf32>
    %13 = vector.broadcast %10 : vector<1x128xf32> to vector<16x128xf32>
    %14 = arith.addf %12, %13 : vector<16x128xf32>
    %cst_10 = arith.constant 0.000000e+00 : f32
    %15 = vector.broadcast %cst_10 : f32 to vector<16x128xf32>
    %16 = arith.maximumf %14, %15 : vector<16x128xf32>
    %c0_11 = arith.constant 0 : index
    %c0_12 = arith.constant 0 : index
    %17 = vector.load %arg4[%c0_11, %c0_12] : memref<128x128xbf16, #tpu.memory_space<vmem>>, vector<128x128xbf16>
    %c0_13 = arith.constant 0 : index
    %c256 = arith.constant 256 : index
    %18 = vector.load %arg8[%c0_13, %c256] : memref<1x768xf32, #tpu.memory_space<vmem>>, vector<1x128xf32>
    %19 = arith.truncf %16 : vector<16x128xf32> to vector<16x128xbf16>
    %cst_14 = arith.constant dense<0.000000e+00> : vector<16x128xf32>
    %20 = tpu.matmul %19, %17, %cst_14 {dimension_numbers = #tpu.dot_dimension_numbers<[1], [0], [0], [1], [0, 0, 1, 1], [], []>} : vector<16x128xbf16>, vector<128x128xbf16>, vector<16x128xf32> -> vector<16x128xf32>
    %21 = vector.broadcast %18 : vector<1x128xf32> to vector<16x128xf32>
    %22 = arith.addf %20, %21 : vector<16x128xf32>
    %c0_15 = arith.constant 0 : index
    %c0_16 = arith.constant 0 : index
    %23 = vector.load %arg9[%c0_15, %c0_16] : memref<16x128xf32, #tpu.memory_space<vmem>>, vector<16x128xf32>
    tpu.vector_store %arg9[%c0_15, %c0_16], %22 {strides = array<i32>} : memref<16x128xf32, #tpu.memory_space<vmem>>, vector<16x128xf32>,
    %c0_17 = arith.constant 0 : index
    %c0_18 = arith.constant 0 : index
    %24 = vector.load %arg5[%c0_17, %c0_18] : memref<128x128xbf16, #tpu.memory_space<vmem>>, vector<128x128xbf16>
    %c0_19 = arith.constant 0 : index
    %c384 = arith.constant 384 : index
    %25 = vector.load %arg8[%c0_19, %c384] : memref<1x768xf32, #tpu.memory_space<vmem>>, vector<1x128xf32>
    %26 = arith.truncf %22 : vector<16x128xf32> to vector<16x128xbf16>
    %cst_20 = arith.constant dense<0.000000e+00> : vector<16x128xf32>
    %27 = tpu.matmul %26, %24, %cst_20 {dimension_numbers = #tpu.dot_dimension_numbers<[1], [0], [0], [1], [0, 0, 1, 1], [], []>} : vector<16x128xbf16>, vector<128x128xbf16>, vector<16x128xf32> -> vector<16x128xf32>
    %28 = vector.broadcast %25 : vector<1x128xf32> to vector<16x128xf32>
    %29 = arith.addf %27, %28 : vector<16x128xf32>
    %cst_21 = arith.constant 0.000000e+00 : f32
    %30 = vector.broadcast %cst_21 : f32 to vector<16x128xf32>
    %31 = arith.maximumf %29, %30 : vector<16x128xf32>
    %c0_22 = arith.constant 0 : index
    %c0_23 = arith.constant 0 : index
    %32 = vector.load %arg6[%c0_22, %c0_23] : memref<128x128xbf16, #tpu.memory_space<vmem>>, vector<128x128xbf16>
    %c0_24 = arith.constant 0 : index
    %c512 = arith.constant 512 : index
    %33 = vector.load %arg8[%c0_24, %c512] : memref<1x768xf32, #tpu.memory_space<vmem>>, vector<1x128xf32>
    %34 = arith.truncf %31 : vector<16x128xf32> to vector<16x128xbf16>
    %cst_25 = arith.constant dense<0.000000e+00> : vector<16x128xf32>
    %35 = tpu.matmul %34, %32, %cst_25 {dimension_numbers = #tpu.dot_dimension_numbers<[1], [0], [0], [1], [0, 0, 1, 1], [], []>} : vector<16x128xbf16>, vector<128x128xbf16>, vector<16x128xf32> -> vector<16x128xf32>
    %36 = vector.broadcast %33 : vector<1x128xf32> to vector<16x128xf32>
    %37 = arith.addf %35, %36 : vector<16x128xf32>
    %cst_26 = arith.constant 0.000000e+00 : f32
    %38 = vector.broadcast %cst_26 : f32 to vector<16x128xf32>
    %39 = arith.maximumf %37, %38 : vector<16x128xf32>
    %c0_27 = arith.constant 0 : index
    %c0_28 = arith.constant 0 : index
    %40 = vector.load %arg7[%c0_27, %c0_28] : memref<128x128xbf16, #tpu.memory_space<vmem>>, vector<128x128xbf16>
    %c0_29 = arith.constant 0 : index
    %c640 = arith.constant 640 : index
    %41 = vector.load %arg8[%c0_29, %c640] : memref<1x768xf32, #tpu.memory_space<vmem>>, vector<1x128xf32>
    %42 = arith.truncf %39 : vector<16x128xf32> to vector<16x128xbf16>
    %cst_30 = arith.constant dense<0.000000e+00> : vector<16x128xf32>
    %43 = tpu.matmul %42, %40, %cst_30 {dimension_numbers = #tpu.dot_dimension_numbers<[1], [0], [0], [1], [0, 0, 1, 1], [], []>} : vector<16x128xbf16>, vector<128x128xbf16>, vector<16x128xf32> -> vector<16x128xf32>
    %44 = vector.broadcast %41 : vector<1x128xf32> to vector<16x128xf32>
    %45 = arith.addf %43, %44 : vector<16x128xf32>
    %c0_31 = arith.constant 0 : index
    %c0_32 = arith.constant 0 : index
    %46 = vector.load %arg10[%c0_31, %c0_32] : memref<16x128xf32, #tpu.memory_space<vmem>>, vector<16x128xf32>
    tpu.vector_store %arg10[%c0_31, %c0_32], %45 {strides = array<i32>} : memref<16x128xf32, #tpu.memory_space<vmem>>, vector<16x128xf32>,
    return
  }
  func.func @transform_0(%arg0: i32) -> (i32, i32) {
    %c0_i32 = arith.constant 0 : i32
    %c0_i32_0 = arith.constant 0 : i32
    return %arg0, %c0_i32 : i32, i32
  }
  func.func @transform_1(%arg0: i32) -> (i32, i32) {
    %c0_i32 = arith.constant 0 : i32
    %c0_i32_0 = arith.constant 0 : i32
    %c0_i32_1 = arith.constant 0 : i32
    return %c0_i32, %c0_i32_0 : i32, i32
  }
  func.func @transform_2(%arg0: i32) -> (i32, i32) {
    %c0_i32 = arith.constant 0 : i32
    %c0_i32_0 = arith.constant 0 : i32
    %c0_i32_1 = arith.constant 0 : i32
    return %c0_i32, %c0_i32_0 : i32, i32
  }
  func.func @transform_3(%arg0: i32) -> (i32, i32) {
    %c0_i32 = arith.constant 0 : i32
    %c0_i32_0 = arith.constant 0 : i32
    %c0_i32_1 = arith.constant 0 : i32
    return %c0_i32, %c0_i32_0 : i32, i32
  }
  func.func @transform_4(%arg0: i32) -> (i32, i32) {
    %c0_i32 = arith.constant 0 : i32
    %c0_i32_0 = arith.constant 0 : i32
    %c0_i32_1 = arith.constant 0 : i32
    return %c0_i32, %c0_i32_0 : i32, i32
  }
  func.func @transform_5(%arg0: i32) -> (i32, i32) {
    %c0_i32 = arith.constant 0 : i32
    %c0_i32_0 = arith.constant 0 : i32
    %c0_i32_1 = arith.constant 0 : i32
    return %c0_i32, %c0_i32_0 : i32, i32
  }
  func.func @transform_6(%arg0: i32) -> (i32, i32) {
    %c0_i32 = arith.constant 0 : i32
    %c0_i32_0 = arith.constant 0 : i32
    %c0_i32_1 = arith.constant 0 : i32
    return %c0_i32, %c0_i32_0 : i32, i32
  }
  func.func @transform_7(%arg0: i32) -> (i32, i32) {
    %c0_i32 = arith.constant 0 : i32
    %c0_i32_0 = arith.constant 0 : i32
    %c0_i32_1 = arith.constant 0 : i32
    return %c0_i32, %c0_i32_0 : i32, i32
  }
  func.func @transform_8(%arg0: i32) -> (i32, i32) {
    %c0_i32 = arith.constant 0 : i32
    %c0_i32_0 = arith.constant 0 : i32
    return %arg0, %c0_i32 : i32, i32
  }
  func.func @transform_9(%arg0: i32) -> (i32, i32) {
    %c0_i32 = arith.constant 0 : i32
    %c0_i32_0 = arith.constant 0 : i32
    return %arg0, %c0_i32 : i32, i32
  }
}

</mosaic_0001>

<bundles_post_ra>
// kernel: autoencoder_forward.1
= control target key start
LH: loop header
LB: loop body
LE: loop exit
PB: predicated region body
PF: predicated region fallthrough
CT: control target
= control target key end

     0   :  { %15 = vsyncpa [#allocation3], 0  ;;  %s2133_s0 = inlined_call_operand.vmem [shape: f32[32,128], index: 0, kind: input, shape index: {}]   ;;  %s2134_s1 = inlined_call_operand.vmem [shape: bf16[128,128], index: 1, kind: input, shape index: {}]   ;;  %s2135_s2 = inlined_call_operand.hbm [shape: bf16[128,128], index: 2, kind: input, shape index: {}]   ;;  %s2136_s3 = inlined_call_operand.hbm [shape: bf16[128,128], index: 3, kind: input, shape index: {}]   ;;  %s2137_s4 = inlined_call_operand.hbm [shape: bf16[128,128], index: 4, kind: input, shape index: {}]   ;;  %s2138_s5 = inlined_call_operand.hbm [shape: bf16[128,128], index: 5, kind: input, shape index: {}]   ;;  %s2139_s6 = inlined_call_operand.hbm [shape: bf16[128,128], index: 6, kind: input, shape index: {}]   ;;  %s2140_s7 = inlined_call_operand.vmem [shape: f32[1,768], index: 7, kind: input, shape index: {}]   ;;  %s2141_s8 = inlined_call_operand.vmem [shape: f32[32,128], index: 8, kind: output, shape index: {0}]   ;;  %s2142_s9 = inlined_call_operand.vmem [shape: f32[32,128], index: 9, kind: output, shape index: {1}]  }
   0x1   :  { %16 = vsyncpa [#allocation5], 0 }
   0x2   :  { %17 = vsyncpa [#allocation8], 0  ;;  %s1837_s30 = smov 0  }
   0x3 LB: > { %s1256_s10 = sadd.s32 4294967295, %s1776_s30   ;;  %p1258_p0 = scmp.ge.s32.totalorder %s1776_s30, 1  ;;  %s1776_s30 = sphi %s1837_s30, %s23_s30  }
   0x4   : > { %p253_p1 = scmp.lt.s32.totalorder %s1776_s30, 3  ;;  %p1847_p2 = scmp.eq.s32.totalorder %s1256_s10, 0 }
   0x5   : > { %s1778_s13 = smov [#allocation4]   ;;  %s1779_s15 = smov [#allocation7]  }
   0x6   : > { %s2146_s11 = scalar_select %p1847_p2, 1, 0 }
   0x7   : > { %p1851_p3 = pnand %p1258_p0, %p253_p1  ;;  %s281_s14 = sshll.u32 %s1778_s13, 4  ;;  %s1855_s14 = int_to_ptr.vmem [resolvable:$true] %s281_s14 }
   0x8   : > { %s307_s16 = sshll.u32 %s1779_s15, 4  ;;  %s1780_s18 = smov [#allocation2]   ;;  %s1859_s16 = int_to_ptr.vmem [resolvable:$true] %s307_s16 }
   0x9   : > { %s2147_s12 = scalar_select %p1851_p3, 1, 0 }
   0xa   : > { %p1527_p4 = pneg %p1851_p3  ;;  %s268_s19 = sshll.u32 %s1780_s18, 4  ;;  %s1867_s19 = int_to_ptr.vmem [resolvable:$true] %s268_s19 }
   0xb   : > { %s1781_s20 = smov [#allocation6]   ;;  %s1618_s24 = scalar_lea.hbm %s2136_s3, 1024 }
   0xc   : > { %p1863_p5 = pnand %p1847_p2, %p1527_p4  ;;  %s1869_s21 = sshll.u32 %s1781_s20, 4  ;;  %s295_s21 = int_to_ptr.vmem [resolvable:$true] %s1869_s21 }
   0xd   : > { %p1619_p6 = scmp.ne.s32.totalorder %s2136_s3, %s1618_s24  ;;  %p1625_p10 = scmp.lt.u32.totalorder %s1618_s24, %s2136_s3 }
   0xe   : > { %p1879_p7 = pneg %p1863_p5 }
  0x10   : > { %p1621_p8 = pnand %p1879_p7, %p1619_p6 }
  0x12   : > { %p1622_p9 = pneg %p1621_p8 }
  0x14   : > { %p1627_p11 = pnand %p1625_p10, %p1622_p9 }
  0x16   : > { %1630 = shalt.err (!%p1627_p11)
}
  0x17   : > { %s1631_s13 = scalar_lea.vmem %s1855_s14, 1024  ;;  %p1639_p1 = scmp.lt.s32.totalorder %s1855_s14, %s1855_s14 }
  0x18   : > { %p1632_p12 = scmp.ne.s32.totalorder %s1855_s14, %s1631_s13  ;;  %p1640_p4 = scmp.lt.s32.totalorder %s1631_s13, %s1631_s13 }
  0x1a   : > { %p1634_p13 = pnand %p1632_p12, %p1879_p7  ;;  %p1641_p6 = por %p1640_p4, %p1639_p1 }
  0x1c   : > { %p1635_p0 = pneg %p1634_p13 }
  0x1e   : > { %p1642_p8 = pnand %p1641_p6, %p1635_p0 }
  0x20   : > { %1645 = shalt.err (!%p1642_p8)
}
  0x21   : > { %s1782_s15 = smov 64   ;;  %s1783_s18 = smov 4  }
  0x22   : > { %1533 = dma.hbm_to_vmem [thread:$0]  (!%p1863_p5), %s2136_s3, 1024, %s1855_s14, [#allocation5], %s1782_s15, %s1782_s15, %s1783_s18  }
  0x23   : > { %s1646_s25 = scalar_lea.hbm %s2138_s5, 1024 }
  0x24   : > { %p1647_p9 = scmp.ne.s32.totalorder %s2138_s5, %s1646_s25  ;;  %p1653_p12 = scmp.lt.u32.totalorder %s1646_s25, %s2138_s5 }
  0x26   : > { %p1649_p10 = pnand %p1647_p9, %p1879_p7 }
  0x28   : > { %p1650_p11 = pneg %p1649_p10 }
  0x2a   : > { %p1655_p13 = pnand %p1653_p12, %p1650_p11 }
  0x2c   : > { %1658 = shalt.err (!%p1655_p13)
}
  0x2d   : > { %s1659_s14 = scalar_lea.vmem %s1859_s16, 1024  ;;  %p1667_p6 = scmp.lt.s32.totalorder %s1859_s16, %s1859_s16 }
  0x2e   : > { %p1660_p0 = scmp.ne.s32.totalorder %s1859_s16, %s1659_s14  ;;  %p1668_p8 = scmp.lt.s32.totalorder %s1659_s14, %s1659_s14 }
  0x30   : > { %p1662_p1 = pnand %p1660_p0, %p1879_p7  ;;  %p1669_p9 = por %p1668_p8, %p1667_p6 }
  0x32   : > { %p1663_p4 = pneg %p1662_p1 }
  0x34   : > { %p1670_p10 = pnand %p1669_p9, %p1663_p4 }
  0x36   : > { %1673 = shalt.err (!%p1670_p10)
}
  0x37   : > { %1539 = dma.hbm_to_vmem [thread:$0]  (!%p1863_p5), %s2138_s5, 1024, %s1859_s16, [#allocation8], %s1782_s15, %s1782_s15, %s1783_s18  }
  0x38   : > { %s1674_s25 = scalar_lea.hbm %s2135_s2, 1024 }
  0x39   : > { %p1675_p11 = scmp.ne.s32.totalorder %s2135_s2, %s1674_s25  ;;  %p1681_p0 = scmp.lt.u32.totalorder %s1674_s25, %s2135_s2 }
  0x3b   : > { %p1677_p12 = pnand %p1675_p11, %p1879_p7 }
  0x3d   : > { %p1678_p13 = pneg %p1677_p12 }
  0x3f   : > { %p1683_p1 = pnand %p1681_p0, %p1678_p13 }
  0x41   : > { %1686 = shalt.err (!%p1683_p1)
}
  0x42   : > { %s1687_s16 = scalar_lea.vmem %s1867_s19, 1024  ;;  %p1695_p9 = scmp.lt.s32.totalorder %s1867_s19, %s1867_s19 }
  0x43   : > { %p1688_p4 = scmp.ne.s32.totalorder %s1867_s19, %s1687_s16  ;;  %p1696_p10 = scmp.lt.s32.totalorder %s1687_s16, %s1687_s16 }
  0x45   : > { %p1690_p6 = pnand %p1688_p4, %p1879_p7  ;;  %p1697_p11 = por %p1696_p10, %p1695_p9 }
  0x47   : > { %p1691_p8 = pneg %p1690_p6 }
  0x49   : > { %p1698_p12 = pnand %p1697_p11, %p1691_p8 }
  0x4b   : > { %1701 = shalt.err (!%p1698_p12)
}
  0x4c   : > { %1530 = dma.hbm_to_vmem [thread:$0]  (!%p1863_p5), %s2135_s2, 1024, %s1867_s19, [#allocation3], %s1782_s15, %s1782_s15, %s1783_s18  }
  0x4d   : > { %s1702_s24 = scalar_lea.hbm %s2137_s4, 1024 }
  0x4e   : > { %p1703_p13 = scmp.ne.s32.totalorder %s2137_s4, %s1702_s24  ;;  %p1709_p4 = scmp.lt.u32.totalorder %s1702_s24, %s2137_s4 }
  0x50   : > { %p1705_p0 = pnand %p1703_p13, %p1879_p7 }
  0x52   : > { %p1706_p1 = pneg %p1705_p0 }
  0x54   : > { %p1711_p6 = pnand %p1709_p4, %p1706_p1 }
  0x56   : > { %1714 = shalt.err (!%p1711_p6)
}
  0x57   : > { %s1715_s13 = scalar_lea.vmem %s295_s21, 1024  ;;  %p1723_p11 = scmp.lt.s32.totalorder %s295_s21, %s295_s21 }
  0x58   : > { %p1716_p8 = scmp.ne.s32.totalorder %s295_s21, %s1715_s13  ;;  %p1724_p12 = scmp.lt.s32.totalorder %s1715_s13, %s1715_s13 }
  0x5a   : > { %p1718_p9 = pnand %p1716_p8, %p1879_p7  ;;  %p1725_p2 = por %p1724_p12, %p1723_p11 }
  0x5c   : > { %p1719_p10 = pneg %p1718_p9 }
  0x5e   : > { %p1726_p3 = pnand %p1725_p2, %p1719_p10 }
  0x60   : > { %1729 = shalt.err (!%p1726_p3)
}
  0x61   : > { %1536 = dma.hbm_to_vmem [thread:$0]  (!%p1863_p5), %s2137_s4, 1024, %s295_s21, [#allocation5], %s1782_s15, %s1782_s15, %s1783_s18  }
  0x62   : > { %s1784_s14 = smov [#allocation9]   ;;  %s1730_s24 = scalar_lea.hbm %s2139_s6, 1024 }
  0x63   : > { %s320_s20 = sshll.u32 %s1784_s14, 4  ;;  %p1731_p2 = scmp.ne.s32.totalorder %s2139_s6, %s1730_s24  ;;  %s321_s20 = int_to_ptr.vmem [resolvable:$true] %s320_s20 }
  0x64   : > { %p1737_p0 = scmp.lt.u32.totalorder %s1730_s24, %s2139_s6 }
  0x65   : > { %p1733_p3 = pnand %p1731_p2, %p1879_p7 }
  0x67   : > { %p1734_p13 = pneg %p1733_p3 }
  0x69   : > { %p1739_p1 = pnand %p1737_p0, %p1734_p13 }
  0x6b   : > { %1742 = shalt.err (!%p1739_p1)
}
  0x6c   : > { %s1743_s21 = scalar_lea.vmem %s321_s20, 1024  ;;  %p1751_p9 = scmp.lt.s32.totalorder %s321_s20, %s321_s20 }
  0x6d   : > { %p1744_p4 = scmp.ne.s32.totalorder %s321_s20, %s1743_s21  ;;  %p1752_p10 = scmp.lt.s32.totalorder %s1743_s21, %s1743_s21 }
  0x6f   : > { %p1746_p6 = pnand %p1744_p4, %p1879_p7  ;;  %p1753_p11 = por %p1752_p10, %p1751_p9 }
  0x71   : > { %p1747_p8 = pneg %p1746_p6 }
  0x73   : > { %p1754_p12 = pnand %p1753_p11, %p1747_p8 }
  0x75   : > { %1757 = shalt.err (!%p1754_p12)
}
  0x76   : > { %1542 = dma.hbm_to_vmem [thread:$0]  (!%p1863_p5), %s2139_s6, 1024, %s321_s20, [#allocation8], %s1782_s15, %s1782_s15, %s1783_s18  }
  0x77   : > { %p2150_p2 = scmp.ne.s32.totalorder %s2147_s12, 0 }
  0x78   : > { %p2151_p7 = scmp.ne.s32.totalorder (!%p2150_p2), %s2146_s11, 0 }
  0x79   : > { %348 = sbr.rel (%p2150_p2) target bundleno = 1482 (0x5ca), region = 52 }
  0x80   : > { %1763 = dma.done.wait (%p2151_p7), [#allocation3], 1024  }
  0x81   : > { %1765 = vsyncadd (%p2151_p7), [#allocation3], 4294966272 }
  0x82   : > { %1767 = dma.done.wait (%p2151_p7), [#allocation5], 2048  }
  0x83   : > { %1769 = vsyncadd (%p2151_p7), [#allocation5], 4294965248 }
  0x84   : > { %1771 = dma.done.wait (%p2151_p7), [#allocation8], 2048  }
  0x85   : > { %1773 = vsyncadd (%p2151_p7), [#allocation8], 4294965248  ;;  %v1785_v0 = vmov 0.0   ;;  %vm1786_vm0 = vmmov 0   ;;  %v1570_v1 = vld [vmem:[%s2134_s1] sm:$0xff]   ;;  %v1571_v2 = vld [vmem:[%s2134_s1 + $0x8] sm:$0xff]  }
  0x86   : > { %1387 = vmatprep.subr.bf16.mxu0 %v1785_v0  ;;  %1403 = vmatprep.mubr.msk.bf16.mxu0 %vm1786_vm0, %v1785_v0  ;;  %s1271_s15 = sshll.u32 %s1256_s10, 1  ;;  %v1572_v3 = vld [vmem:[%s2134_s1 + $0x10] sm:$0xff]   ;;  %v1578_v4 = vld [vmem:[#allocation2] sm:$0xff]   ;;  %v1573_v5 = vld [vmem:[%s2134_s1 + $0x18] sm:$0xff]  }
  0x87   : > { %1407 = vmatprep.subr.bf16.mxu1 %v1785_v0  ;;  %1423 = vmatprep.mubr.msk.bf16.mxu1 %vm1786_vm0, %v1785_v0  ;;  %p406_p5 = scmp.lt.s32.totalorder %s1271_s15, 3  ;;  %v1579_v6 = vld [vmem:[#allocation2 + $0x8] sm:$0xff]   ;;  %v1574_v7 = vld [vmem:[%s2134_s1 + $0x20] sm:$0xff]   ;;  %v1580_v8 = vld [vmem:[#allocation2 + $0x10] sm:$0xff]  }
  0x88   : > { %1388 = vmatpush3.bf16.msra.mxu0 %v1570_v1  ;;  %1408 = vmatpush3.bf16.msra.mxu1 %v1578_v4  ;;  %v1575_v9 = vld [vmem:[%s2134_s1 + $0x28] sm:$0xff]   ;;  %v1581_v10 = vld [vmem:[#allocation2 + $0x18] sm:$0xff]   ;;  %v1576_v11 = vld [vmem:[%s2134_s1 + $0x30] sm:$0xff]  }
  0x89   : > { %1389 = vmatprep.subr.bf16.mxu0 %v1785_v0  ;;  %s2153_s15 = smov (!%p406_p5, %s1271_s15), 3  ;;  %1409 = vmatprep.subr.bf16.mxu1 %v1785_v0  ;;  %v1582_v12 = vld [vmem:[#allocation2 + $0x20] sm:$0xff]   ;;  %v1577_v13 = vld [vmem:[%s2134_s1 + $0x38] sm:$0xff]   ;;  %v1583_v16 = vld [vmem:[#allocation2 + $0x28] sm:$0xff]  }
  0x8a   : > { %s2039_s23 = sshll.u32 %s2153_s15, 3  ;;  %v1584_v18 = vld [vmem:[#allocation2 + $0x30] sm:$0xff]   ;;  %v1585_v19 = vld [vmem:[#allocation2 + $0x38] sm:$0xff]   ;;  %v1586_v20 = vld [vmem:[#allocation4] sm:$0xff]  }
  0x8b   : > { %s409_s13 = scalar_lea.vmem %s2133_s0, %s2039_s23  ;;  %v1587_v21 = vld [vmem:[#allocation4 + $0x8] sm:$0xff]   ;;  %v1588_v22 = vld [vmem:[#allocation4 + $0x10] sm:$0xff]   ;;  %v1589_v23 = vld [vmem:[#allocation4 + $0x18] sm:$0xff]   ;;  %s415_s10 = scalar_lea.vmem %s2141_s8, %s2039_s23 }
  0x8c   : > { %1390 = vmatpush3.bf16.msra.mxu0 %v1571_v2  ;;  %1410 = vmatpush3.bf16.msra.mxu1 %v1579_v6  ;;  %v424_v14 = vld [vmem:[%s409_s13] sm:$0xff]  ;;  %v425_v15 = vld [vmem:[%s409_s13 + $0x8] sm:$0xff]  ;;  %v1592_v36 = vld [vmem:[#allocation4 + $0x30] sm:$0xff]   ;;  %s421_s19 = scalar_lea.vmem %s2142_s9, %s2039_s23 }
  0x8d   : > { %1391 = vmatprep.subr.bf16.mxu0 %v1785_v0  ;;  %1411 = vmatprep.subr.bf16.mxu1 %v1785_v0  ;;  %v443_v17 = vpack.c.bf16 %v425_v15, %v424_v14  ;;  %v1590_v24 = vld [vmem:[#allocation4 + $0x20] sm:$0xff]   ;;  %v1591_v25 = vld [vmem:[#allocation4 + $0x28] sm:$0xff]   ;;  %v1593_v37 = vld [vmem:[#allocation4 + $0x38] sm:$0xff]  }
  0x8e   : > { %v1277_v26 = vld [vmem:[%s2140_s7] ss:$0 sm:$0xff]  ;;  %v1595_v39 = vld [vmem:[#allocation6 + $0x8] sm:$0xff]   ;;  %v1596_v40 = vld [vmem:[#allocation6 + $0x10] sm:$0xff]  }
  0x8f   : > { %v1594_v38 = vld [vmem:[#allocation6] sm:$0xff]   ;;  %v1597_v41 = vld [vmem:[#allocation6 + $0x18] sm:$0xff]   ;;  %v1599_v43 = vld [vmem:[#allocation6 + $0x28] sm:$0xff]  }
  0x90   : > { %1392 = vmatpush3.bf16.msra.mxu0 %v1572_v3  ;;  %1412 = vmatpush3.bf16.msra.mxu1 %v1580_v8  ;;  %v1598_v42 = vld [vmem:[#allocation6 + $0x20] sm:$0xff]   ;;  %v1600_v54 = vld [vmem:[#allocation6 + $0x30] sm:$0xff]   ;;  %v1601_v55 = vld [vmem:[#allocation6 + $0x38] sm:$0xff]  }
  0x91   : > { %1393 = vmatprep.subr.bf16.mxu0 %v1785_v0  ;;  %1413 = vmatprep.subr.bf16.mxu1 %v1785_v0  ;;  %v1286_v44 = vld [vmem:[%s2140_s7 + $0x1] ss:$0 sm:$0xff]  ;;  %v1603_v57 = vld [vmem:[#allocation7 + $0x8] sm:$0xff]   ;;  %v1604_v58 = vld [vmem:[#allocation7 + $0x10] sm:$0xff]  }
  0x92   : > { %v1602_v56 = vld [vmem:[#allocation7] sm:$0xff]   ;;  %v1605_v59 = vld [vmem:[#allocation7 + $0x18] sm:$0xff]   ;;  %v1607_v61 = vld [vmem:[#allocation7 + $0x28] sm:$0xff]  }
  0x93   : > { %v1606_v60 = vld [vmem:[#allocation7 + $0x20] sm:$0xff]   ;;  %v1609_v8 = vld [vmem:[#allocation7 + $0x38] sm:$0xff]   ;;  %v1615_v14 = vld [vmem:[#allocation9 + $0x28] sm:$0xff]  }
  0x94   : > { %1394 = vmatpush3.bf16.msra.mxu0 %v1573_v5  ;;  %1414 = vmatpush3.bf16.msra.mxu1 %v1581_v10  ;;  %v1295_v62 = vld [vmem:[%s2140_s7 + $0x2] ss:$0 sm:$0xff]  ;;  %v1611_v10 = vld [vmem:[#allocation9 + $0x8] sm:$0xff]   ;;  %v1304_v15 = vld [vmem:[%s2140_s7 + $0x3] ss:$0 sm:$0xff] }
  0x95   : > { %1395 = vmatprep.subr.bf16.mxu0 %v1785_v0  ;;  %1415 = vmatprep.subr.bf16.mxu1 %v1785_v0 }
  0x98   : > { %1396 = vmatpush3.bf16.msra.mxu0 %v1574_v7  ;;  %1416 = vmatpush3.bf16.msra.mxu1 %v1582_v12  ;;  %v1608_v7 = vld [vmem:[#allocation7 + $0x30] sm:$0xff]   ;;  %v1613_v12 = vld [vmem:[#allocation9 + $0x18] sm:$0xff]  }
  0x99   : > { %1397 = vmatprep.subr.bf16.mxu0 %v1785_v0  ;;  %1417 = vmatprep.subr.bf16.mxu1 %v1785_v0 }
  0x9c   : > { %1398 = vmatpush3.bf16.msra.mxu0 %v1575_v9  ;;  %1418 = vmatpush3.bf16.msra.mxu1 %v1583_v16  ;;  %v1610_v9 = vld [vmem:[#allocation9] sm:$0xff]  }
  0x9d   : > { %1399 = vmatprep.subr.bf16.mxu0 %v1785_v0  ;;  %1419 = vmatprep.subr.bf16.mxu1 %v1785_v0 }
  0xa0   : > { %1400 = vmatpush3.bf16.msra.mxu0 %v1576_v11  ;;  %1420 = vmatpush3.bf16.msra.mxu1 %v1584_v18  ;;  %v1612_v11 = vld [vmem:[#allocation9 + $0x10] sm:$0xff]  }
  0xa1   : > { %1401 = vmatprep.subr.bf16.mxu0 %v1785_v0  ;;  %1421 = vmatprep.subr.bf16.mxu1 %v1785_v0 }
  0xa4   : > { %1402 = vmatpush3.bf16.msra.mxu0 %v1577_v13  ;;  %1422 = vmatpush3.bf16.msra.mxu1 %v1585_v19  ;;  %v1614_v13 = vld [vmem:[#allocation9 + $0x20] sm:$0xff]  }
  0xa5   : > { %1427 = vmatprep.subr.bf16.mxu0 %v1785_v0  ;;  %1447 = vmatprep.subr.bf16.mxu1 %v1785_v0 }
  0xa7   : > { %1404 = vmatmul.mubr.bf16.vlgmr.msra.gmra.mrb[0].mxu0 %v443_v17 }
  0xa8   : > { %1443 = vmatprep.mubr.msk.bf16.mxu0 %vm1786_vm0, %v1785_v0  ;;  %1428 = vmatpush3.bf16.msra.mxu0 %v1586_v20 }
  0xa9   : > { %1429 = vmatprep.subr.bf16.mxu0 %v1785_v0 }
  0xac   : > { %1430 = vmatpush3.bf16.msra.mxu0 %v1587_v21 }
  0xad   : > { %1431 = vmatprep.subr.bf16.mxu0 %v1785_v0 }
  0xb0   : > { %1432 = vmatpush3.bf16.msra.mxu0 %v1588_v22 }
  0xb1   : > { %1433 = vmatprep.subr.bf16.mxu0 %v1785_v0 }
  0xb4   : > { %1434 = vmatpush3.bf16.msra.mxu0 %v1589_v23 }
  0xb5   : > { %1435 = vmatprep.subr.bf16.mxu0 %v1785_v0 }
  0xb8   : > { %1436 = vmatpush3.bf16.msra.mxu0 %v1590_v24 }
  0xb9   : > { %1437 = vmatprep.subr.bf16.mxu0 %v1785_v0 }
  0xbc   : > { %1438 = vmatpush3.bf16.msra.mxu0 %v1591_v25  ;;  %v1616_v25 = vld [vmem:[#allocation9 + $0x30] sm:$0xff]  }
  0xbd   : > { %1439 = vmatprep.subr.bf16.mxu0 %v1785_v0 }
  0xc0   : > { %1440 = vmatpush3.bf16.msra.mxu0 %v1592_v36 }
  0xc1   : > { %1441 = vmatprep.subr.bf16.mxu0 %v1785_v0 }
  0xc4   : > { %1442 = vmatpush3.bf16.msra.mxu0 %v1593_v37 }
  0xc5   : > { %1467 = vmatprep.subr.bf16.mxu0 %v1785_v0 }
 0x17a   : > { %v532_v27 = vpop.f32.mrb[0].mxu0 }
 0x17b   : > { %v533_v28 = vadd.f32 %v1277_v26, %v532_v27  ;;  %v1405_v29 = vpop.f32.mrb[1].mxu0  ;;  %v1313_v27 = vld [vmem:[%s2140_s7 + $0x4] ss:$0 sm:$0xff] }
 0x17c   : > { %v535_v30 = vpop.f32.mrb[2].mxu0 }
 0x17d   : > { %v536_v31 = vadd.f32 %v1277_v26, %v535_v30  ;;  %v1406_v32 = vpop.f32.mrb[3].mxu0  ;;  %v539_v33 = vmax.f32 %v533_v28, 0.0  ;;  %v1617_v26 = vld [vmem:[#allocation9 + $0x38] sm:$0xff]  }
 0x17f   : > { %v540_v34 = vmax.f32 %v536_v31, 0.0 }
 0x181   : > { %v558_v35 = vpack.c.bf16 %v540_v34, %v539_v33 }
 0x183   : > { %1424 = vmatmul.mubr.bf16.vlgmr.msra.gmra.mrb[0].mxu1 %v558_v35 }
 0x184   : > { %1463 = vmatprep.mubr.msk.bf16.mxu1 %vm1786_vm0, %v1785_v0  ;;  %1448 = vmatpush3.bf16.msra.mxu1 %v1594_v38 }
 0x185   : > { %1449 = vmatprep.subr.bf16.mxu1 %v1785_v0 }
 0x188   : > { %1450 = vmatpush3.bf16.msra.mxu1 %v1595_v39 }
 0x189   : > { %1451 = vmatprep.subr.bf16.mxu1 %v1785_v0 }
 0x18c   : > { %1452 = vmatpush3.bf16.msra.mxu1 %v1596_v40 }
 0x18d   : > { %1453 = vmatprep.subr.bf16.mxu1 %v1785_v0 }
 0x190   : > { %1454 = vmatpush3.bf16.msra.mxu1 %v1597_v41 }
 0x191   : > { %1455 = vmatprep.subr.bf16.mxu1 %v1785_v0 }
 0x194   : > { %1456 = vmatpush3.bf16.msra.mxu1 %v1598_v42 }
 0x195   : > { %1457 = vmatprep.subr.bf16.mxu1 %v1785_v0 }
 0x198   : > { %1458 = vmatpush3.bf16.msra.mxu1 %v1599_v43 }
 0x199   : > { %1459 = vmatprep.subr.bf16.mxu1 %v1785_v0 }
 0x19c   : > { %1460 = vmatpush3.bf16.msra.mxu1 %v1600_v54 }
 0x19d   : > { %1461 = vmatprep.subr.bf16.mxu1 %v1785_v0 }
 0x1a0   : > { %1462 = vmatpush3.bf16.msra.mxu1 %v1601_v55 }
 0x1a1   : > { %1487 = vmatprep.subr.bf16.mxu1 %v1785_v0 }
 0x256   : > { %v647_v45 = vpop.f32.mrb[0].mxu1 }
 0x257   : > { %v648_v46 = vadd.f32 %v1286_v44, %v647_v45  ;;  %v1425_v47 = vpop.f32.mrb[1].mxu1 }
 0x258   : > { %v650_v48 = vpop.f32.mrb[2].mxu1 }
 0x259   : > { %v651_v49 = vadd.f32 %v1286_v44, %v650_v48  ;;  %v1426_v50 = vpop.f32.mrb[3].mxu1  ;;  %v654_v51 = vmax.f32 %v648_v46, 0.0 }
 0x25b   : > { %v655_v52 = vmax.f32 %v651_v49, 0.0 }
 0x25d   : > { %v673_v53 = vpack.c.bf16 %v655_v52, %v654_v51 }
 0x25f   : > { %1444 = vmatmul.mubr.bf16.vlgmr.msra.gmra.mrb[4].mxu0 %v673_v53 }
 0x260   : > { %1483 = vmatprep.mubr.msk.bf16.mxu0 %vm1786_vm0, %v1785_v0  ;;  %1468 = vmatpush3.bf16.msra.mxu0 %v1602_v56 }
 0x261   : > { %1469 = vmatprep.subr.bf16.mxu0 %v1785_v0 }
 0x264   : > { %1470 = vmatpush3.bf16.msra.mxu0 %v1603_v57 }
 0x265   : > { %1471 = vmatprep.subr.bf16.mxu0 %v1785_v0 }
 0x268   : > { %1472 = vmatpush3.bf16.msra.mxu0 %v1604_v58 }
 0x269   : > { %1473 = vmatprep.subr.bf16.mxu0 %v1785_v0 }
 0x26c   : > { %1474 = vmatpush3.bf16.msra.mxu0 %v1605_v59 }
 0x26d   : > { %1475 = vmatprep.subr.bf16.mxu0 %v1785_v0 }
 0x270   : > { %1476 = vmatpush3.bf16.msra.mxu0 %v1606_v60 }
 0x271   : > { %1477 = vmatprep.subr.bf16.mxu0 %v1785_v0 }
 0x274   : > { %1478 = vmatpush3.bf16.msra.mxu0 %v1607_v61 }
 0x275   : > { %1479 = vmatprep.subr.bf16.mxu0 %v1785_v0 }
 0x278   : > { %1480 = vmatpush3.bf16.msra.mxu0 %v1608_v7 }
 0x279   : > { %1481 = vmatprep.subr.bf16.mxu0 %v1785_v0 }
 0x27c   : > { %1482 = vmatpush3.bf16.msra.mxu0 %v1609_v8 }
 0x332   : > { %v762_v63 = vpop.f32.mrb[4].mxu0 }
 0x333   : > { %v763_v1 = vadd.f32 %v1295_v62, %v762_v63  ;;  %v1445_v2 = vpop.f32.mrb[5].mxu0 }
 0x334   : > { %v765_v3 = vpop.f32.mrb[6].mxu0 }
 0x335   : > { %769 = vst [vmem:[%s415_s10] sm:$0xff] %v763_v1  ;;  %v766_v4 = vadd.f32 %v1295_v62, %v765_v3  ;;  %v1446_v5 = vpop.f32.mrb[7].mxu0 }
 0x337   : > { %770 = vst [vmem:[%s415_s10 + $0x8] sm:$0xff] %v766_v4  ;;  %v788_v6 = vpack.c.bf16 %v766_v4, %v763_v1 }
 0x339   : > { %1464 = vmatmul.mubr.bf16.vlgmr.msra.gmra.mrb[4].mxu1 %v788_v6 }
 0x33a   : > { %1503 = vmatprep.mubr.msk.bf16.mxu1 %vm1786_vm0, %v1785_v0  ;;  %1488 = vmatpush3.bf16.msra.mxu1 %v1610_v9 }
 0x33b   : > { %1489 = vmatprep.subr.bf16.mxu1 %v1785_v0 }
 0x33e   : > { %1490 = vmatpush3.bf16.msra.mxu1 %v1611_v10 }
 0x33f   : > { %1491 = vmatprep.subr.bf16.mxu1 %v1785_v0 }
 0x342   : > { %1492 = vmatpush3.bf16.msra.mxu1 %v1612_v11 }
 0x343   : > { %1493 = vmatprep.subr.bf16.mxu1 %v1785_v0 }
 0x346   : > { %1494 = vmatpush3.bf16.msra.mxu1 %v1613_v12 }
 0x347   : > { %1495 = vmatprep.subr.bf16.mxu1 %v1785_v0 }
 0x34a   : > { %1496 = vmatpush3.bf16.msra.mxu1 %v1614_v13 }
 0x34b   : > { %1497 = vmatprep.subr.bf16.mxu1 %v1785_v0 }
 0x34e   : > { %1498 = vmatpush3.bf16.msra.mxu1 %v1615_v14 }
 0x34f   : > { %1499 = vmatprep.subr.bf16.mxu1 %v1785_v0 }
 0x352   : > { %1500 = vmatpush3.bf16.msra.mxu1 %v1616_v25 }
 0x353   : > { %1501 = vmatprep.subr.bf16.mxu1 %v1785_v0  ;;  %v1322_v0 = vld [vmem:[%s2140_s7 + $0x5] ss:$0 sm:$0xff] }
 0x356   : > { %1502 = vmatpush3.bf16.msra.mxu1 %v1617_v26 }
 0x40c   : > { %v877_v16 = vpop.f32.mrb[4].mxu1 }
 0x40d   : > { %v878_v17 = vadd.f32 %v1304_v15, %v877_v16  ;;  %v1465_v18 = vpop.f32.mrb[5].mxu1 }
 0x40e   : > { %v880_v19 = vpop.f32.mrb[6].mxu1 }
 0x40f   : > { %v881_v20 = vadd.f32 %v1304_v15, %v880_v19  ;;  %v1466_v21 = vpop.f32.mrb[7].mxu1  ;;  %v884_v22 = vmax.f32 %v878_v17, 0.0 }
 0x411   : > { %v885_v23 = vmax.f32 %v881_v20, 0.0 }
 0x413   : > { %v903_v24 = vpack.c.bf16 %v885_v23, %v884_v22 }
 0x415   : > { %1484 = vmatmul.mubr.bf16.vlgmr.msra.gmra.mrb[8].mxu0 %v903_v24 }
 0x4e8   : > { %v992_v28 = vpop.f32.mrb[8].mxu0 }
 0x4e9   : > { %v993_v29 = vadd.f32 %v1313_v27, %v992_v28  ;;  %v1485_v30 = vpop.f32.mrb[9].mxu0 }
 0x4ea   : > { %v995_v31 = vpop.f32.mrb[10].mxu0 }
 0x4eb   : > { %v996_v32 = vadd.f32 %v1313_v27, %v995_v31  ;;  %v1486_v33 = vpop.f32.mrb[11].mxu0  ;;  %v999_v34 = vmax.f32 %v993_v29, 0.0 }
 0x4ed   : > { %v1000_v35 = vmax.f32 %v996_v32, 0.0 }
 0x4ef   : > { %v1018_v36 = vpack.c.bf16 %v1000_v35, %v999_v34 }
 0x4f1   : > { %1504 = vmatmul.mubr.bf16.vlgmr.msra.gmra.mrb[8].mxu1 %v1018_v36 }
 0x5c4   : > { %v1107_v37 = vpop.f32.mrb[8].mxu1 }
 0x5c5   : > { %v1108_v38 = vadd.f32 %v1322_v0, %v1107_v37  ;;  %v1505_v39 = vpop.f32.mrb[9].mxu1 }
 0x5c6   : > { %v1110_v40 = vpop.f32.mrb[10].mxu1 }
 0x5c7   : > { %1114 = vst [vmem:[%s421_s19] sm:$0xff] %v1108_v38  ;;  %v1111_v41 = vadd.f32 %v1322_v0, %v1110_v40  ;;  %v1506_v42 = vpop.f32.mrb[11].mxu1 }
 0x5c9   : > { %1115 = vst [vmem:[%s421_s19 + $0x8] sm:$0xff] %v1111_v41 }
 0x5ca PF: > { %s23_s30 = sadd.s32 1, %s1776_s30  }
 0x5cb   : > { %p20_p3 = scmp.ge.s32.totalorder %s23_s30, 4  }
 0x5cd   :  { %22 = sbr.rel (!%p20_p3) target bundleno = 3 (0x3), region = 115 }
 0x5d4   :  { %1155 = vsyncpa [#allocation3], 1 }
 0x5d5   :  { %1157 = vsyncpa [#allocation3 + $0x1], 1 }
 0x5d6   :  { %1158 = vsyncpa [#allocation5], 1 }
 0x5d7   :  { %1159 = vsyncpa [#allocation8], 1 }

</bundles_post_ra>
